<compile_context>
chip_gen: v7x
topology: tpu7x:2x2x1
jax: 0.10.0
libtpu: 0.0.40
codegen_flags: <defaults>
</compile_context>

<pallas_src>
import jax
import jax.numpy as jnp
from jax.experimental import pallas as pl
from jax.experimental.pallas import tpu as pltpu


# ----------------------------------------------------------------------------
# Pallas kernel: 3x3 single-channel "same" conv on a block of (steps, feat)
# planes.  All halos (rows AND columns) are already in the padded input block.
# ----------------------------------------------------------------------------
def _conv3x3_kernel(w_ref, x_ref, o_ref):
    # w_ref: SMEM (10,)  scalar-prefetched: 3x3 taps row-major + bias.
    # x_ref: VMEM (Bblk, T+2, F+2)  halo-padded planes (rows 1..T, cols 1..F real).
    # o_ref: VMEM (Bblk, T, F)
    bblk, T, F = o_ref.shape

    # Hoist the 10 scalar SMEM reads out of the accumulation loop.
    taps = [w_ref[i] for i in range(9)]
    bias = w_ref[9]

    x = x_ref[...]                                    # one VMEM load of the block

    # Deduplicated column (lane) shifts: build the 3 column-shifted planes once
    # (df=0 is lane-aligned; df=1,2 are the only cross-lane ops) and reuse them
    # across the 3 row offsets below.
    cols = [x[:, :, df:df + F] for df in range(3)]    # each (Bblk, T+2, F)

    # Bias-initialised f32 accumulator (broadcast hoisted out of the loop),
    # then 9 scalar-broadcast VPU FMAs; row offsets are cheap sublane slices.
    acc = jnp.full((bblk, T, F), bias, dtype=jnp.float32)
    for dt in range(3):
        for df in range(3):
            acc = acc + taps[dt * 3 + df] * cols[df][:, dt:dt + T, :]

    o_ref[...] = acc.astype(o_ref.dtype)


# ----------------------------------------------------------------------------
# Wrapper: layout plumbing (permute + halo pad) + pallas_call.
# ----------------------------------------------------------------------------
def cnn_on_batch_forward(x, w, b):
    """x: (T, B, F) float32; w: (3, 3) conv weight (out=in=1 squeezed); b: scalar."""
    x = x.astype(jnp.float32)
    T, B, F = x.shape

    # (T, B, F) -> (B, T, F) with a 1-element zero halo on rows and columns
    # (= Conv2d padding 1).  Transpose + pad fuse into a single HBM pass and the
    # padded array is only (T+2)(F+2)/(T*F) of the real data -- no 128-lane padding.
    xb = jnp.transpose(x, (1, 0, 2))
    xh = jnp.pad(xb, ((0, 0), (1, 1), (1, 1)))

    # 3x3 taps (row-major) + bias -> flat (10,) f32 vector, scalar-prefetched to SMEM.
    w_flat = jnp.concatenate(
        [w.reshape(-1).astype(jnp.float32), jnp.reshape(b, (1,)).astype(jnp.float32)])

    # How many batch planes per grid step: the largest divisor of B whose
    # (input + output) block stays under a per-buffer budget, so the
    # double-buffered pipeline plus in-kernel temporaries fit scoped VMEM.
    plane_bytes = ((T + 2) * (F + 2) + T * F) * 4
    budget_bytes = 6 * 1024 * 1024
    bblk = 1
    for d in range(1, B + 1):
        if B % d == 0 and d * plane_bytes <= budget_bytes:
            bblk = d
    grid = (B // bblk,)

    # Explicit scoped-VMEM allowance: 2x double-buffered blocks + temporaries + slack.
    vmem_limit = int(min(48 * 1024 * 1024, max(32 * 1024 * 1024, 6 * bblk * plane_bytes)))

    out = pl.pallas_call(
        _conv3x3_kernel,
        out_shape=jax.ShapeDtypeStruct((B, T, F), jnp.float32),
        grid_spec=pltpu.PrefetchScalarGridSpec(
            num_scalar_prefetch=1,
            grid=grid,
            in_specs=[
                # Last two dims equal the full array dims -> no (8,128) rounding.
                pl.BlockSpec((bblk, T + 2, F + 2), lambda i, w_s: (i, 0, 0)),
            ],
            out_specs=pl.BlockSpec((bblk, T, F), lambda i, w_s: (i, 0, 0)),
        ),
        compiler_params=pltpu.CompilerParams(
            dimension_semantics=("parallel",),
            vmem_limit_bytes=vmem_limit),
    )(w_flat, xh)

    # Back to the module's (steps, batch, feat) layout.
    return jnp.transpose(out, (1, 0, 2))
    # TODO(synk): for very large (steps, feat) planes, tile the steps axis with
    # 1-row-halo blocks (second "parallel" grid axis, keeps both v7x TensorCores
    # busy and caps VMEM under its 64 MiB), and optionally pack several batch
    # elements along the lane dim when F << 128.


# ----------------------------------------------------------------------------
# Pure-JAX reference (matches torch.nn.Conv2d: cross-correlation + bias).
# ----------------------------------------------------------------------------
def ref_forward(x, w, b):
    T, B, F = x.shape
    xb = jnp.transpose(x, (1, 0, 2)).reshape(B, 1, T, F)
    out = jax.lax.conv_general_dilated(
        xb, w.reshape(1, 1, 3, 3).astype(jnp.float32),
        window_strides=(1, 1), padding=((1, 1), (1, 1)),
        dimension_numbers=("NCHW", "OIHW", "NCHW")) + b
    return jnp.transpose(out.reshape(B, T, F), (1, 0, 2))


if __name__ == "__main__":
    steps, batch, feat = 8, 2, 16

    key = jax.random.PRNGKey(0)
    kx, kw, kb = jax.random.split(key, 3)
    x = jax.random.normal(kx, (steps, batch, feat), jnp.float32)
    # nn.Conv2d default init: U(-1/sqrt(fan_in), +1/sqrt(fan_in)), fan_in = 1*3*3 = 9
    k = 1.0 / 3.0
    w = jax.random.uniform(kw, (3, 3), jnp.float32, -k, k)
    b = jax.random.uniform(kb, (), jnp.float32, -k, k)

    out = jax.jit(cnn_on_batch_forward)(x, w, b)
    jax.block_until_ready(out)

    ref = ref_forward(x, w, b)
    assert out.shape == (steps, batch, feat)
    assert jnp.allclose(out, ref, atol=1e-5, rtol=1e-5), \
        f"max abs err = {jnp.max(jnp.abs(out - ref))}"

    print("KERNEL_OK")
</pallas_src>

<mosaic_0001>
module attributes {stable_mosaic.version = 11 : i64} {
  func.func @_conv3x3_kernel(%arg0: i32, %arg1: memref<10xf32, #tpu.memory_space<smem>>, %arg2: memref<2x10x18xf32, #tpu.memory_space<vmem>>, %arg3: memref<2x8x16xf32, #tpu.memory_space<vmem>>) attributes {dimension_semantics = [#tpu.dimension_semantics<parallel>], iteration_bounds = array<i64: 1>, scalar_prefetch = 1 : i64, scratch_operands = 0 : i64, tpu.core_type = #tpu.core_type<tc>, window_params = [{transform_indices = @transform_0, window_bounds = array<i64: 2, 10, 18>}, {transform_indices = @transform_1, window_bounds = array<i64: 2, 8, 16>}]} {
    %c0 = arith.constant 0 : index
    %0 = memref.load %arg1[%c0] : memref<10xf32, #tpu.memory_space<smem>>
    %c1 = arith.constant 1 : index
    %1 = memref.load %arg1[%c1] : memref<10xf32, #tpu.memory_space<smem>>
    %c2 = arith.constant 2 : index
    %2 = memref.load %arg1[%c2] : memref<10xf32, #tpu.memory_space<smem>>
    %c3 = arith.constant 3 : index
    %3 = memref.load %arg1[%c3] : memref<10xf32, #tpu.memory_space<smem>>
    %c4 = arith.constant 4 : index
    %4 = memref.load %arg1[%c4] : memref<10xf32, #tpu.memory_space<smem>>
    %c5 = arith.constant 5 : index
    %5 = memref.load %arg1[%c5] : memref<10xf32, #tpu.memory_space<smem>>
    %c6 = arith.constant 6 : index
    %6 = memref.load %arg1[%c6] : memref<10xf32, #tpu.memory_space<smem>>
    %c7 = arith.constant 7 : index
    %7 = memref.load %arg1[%c7] : memref<10xf32, #tpu.memory_space<smem>>
    %c8 = arith.constant 8 : index
    %8 = memref.load %arg1[%c8] : memref<10xf32, #tpu.memory_space<smem>>
    %c9 = arith.constant 9 : index
    %9 = memref.load %arg1[%c9] : memref<10xf32, #tpu.memory_space<smem>>
    %c0_0 = arith.constant 0 : index
    %c0_1 = arith.constant 0 : index
    %c0_2 = arith.constant 0 : index
    %10 = vector.load %arg2[%c0_0, %c0_1, %c0_2] : memref<2x10x18xf32, #tpu.memory_space<vmem>>, vector<2x10x18xf32>
    %11 = vector.extract_strided_slice %10 {offsets = [0, 0, 0], sizes = [2, 10, 16], strides = [1, 1, 1]} : vector<2x10x18xf32> to vector<2x10x16xf32>
    %12 = vector.extract_strided_slice %10 {offsets = [0, 0, 1], sizes = [2, 10, 16], strides = [1, 1, 1]} : vector<2x10x18xf32> to vector<2x10x16xf32>
    %13 = vector.extract_strided_slice %10 {offsets = [0, 0, 2], sizes = [2, 10, 16], strides = [1, 1, 1]} : vector<2x10x18xf32> to vector<2x10x16xf32>
    %14 = vector.broadcast %9 : f32 to vector<2x8x16xf32>
    %15 = vector.extract_strided_slice %11 {offsets = [0, 0, 0], sizes = [2, 8, 16], strides = [1, 1, 1]} : vector<2x10x16xf32> to vector<2x8x16xf32>
    %16 = vector.broadcast %0 : f32 to vector<2x8x16xf32>
    %17 = arith.mulf %16, %15 : vector<2x8x16xf32>
    %18 = arith.addf %14, %17 : vector<2x8x16xf32>
    %19 = vector.extract_strided_slice %12 {offsets = [0, 0, 0], sizes = [2, 8, 16], strides = [1, 1, 1]} : vector<2x10x16xf32> to vector<2x8x16xf32>
    %20 = vector.broadcast %1 : f32 to vector<2x8x16xf32>
    %21 = arith.mulf %20, %19 : vector<2x8x16xf32>
    %22 = arith.addf %18, %21 : vector<2x8x16xf32>
    %23 = vector.extract_strided_slice %13 {offsets = [0, 0, 0], sizes = [2, 8, 16], strides = [1, 1, 1]} : vector<2x10x16xf32> to vector<2x8x16xf32>
    %24 = vector.broadcast %2 : f32 to vector<2x8x16xf32>
    %25 = arith.mulf %24, %23 : vector<2x8x16xf32>
    %26 = arith.addf %22, %25 : vector<2x8x16xf32>
    %27 = vector.extract_strided_slice %11 {offsets = [0, 1, 0], sizes = [2, 8, 16], strides = [1, 1, 1]} : vector<2x10x16xf32> to vector<2x8x16xf32>
    %28 = vector.broadcast %3 : f32 to vector<2x8x16xf32>
    %29 = arith.mulf %28, %27 : vector<2x8x16xf32>
    %30 = arith.addf %26, %29 : vector<2x8x16xf32>
    %31 = vector.extract_strided_slice %12 {offsets = [0, 1, 0], sizes = [2, 8, 16], strides = [1, 1, 1]} : vector<2x10x16xf32> to vector<2x8x16xf32>
    %32 = vector.broadcast %4 : f32 to vector<2x8x16xf32>
    %33 = arith.mulf %32, %31 : vector<2x8x16xf32>
    %34 = arith.addf %30, %33 : vector<2x8x16xf32>
    %35 = vector.extract_strided_slice %13 {offsets = [0, 1, 0], sizes = [2, 8, 16], strides = [1, 1, 1]} : vector<2x10x16xf32> to vector<2x8x16xf32>
    %36 = vector.broadcast %5 : f32 to vector<2x8x16xf32>
    %37 = arith.mulf %36, %35 : vector<2x8x16xf32>
    %38 = arith.addf %34, %37 : vector<2x8x16xf32>
    %39 = vector.extract_strided_slice %11 {offsets = [0, 2, 0], sizes = [2, 8, 16], strides = [1, 1, 1]} : vector<2x10x16xf32> to vector<2x8x16xf32>
    %40 = vector.broadcast %6 : f32 to vector<2x8x16xf32>
    %41 = arith.mulf %40, %39 : vector<2x8x16xf32>
    %42 = arith.addf %38, %41 : vector<2x8x16xf32>
    %43 = vector.extract_strided_slice %12 {offsets = [0, 2, 0], sizes = [2, 8, 16], strides = [1, 1, 1]} : vector<2x10x16xf32> to vector<2x8x16xf32>
    %44 = vector.broadcast %7 : f32 to vector<2x8x16xf32>
    %45 = arith.mulf %44, %43 : vector<2x8x16xf32>
    %46 = arith.addf %42, %45 : vector<2x8x16xf32>
    %47 = vector.extract_strided_slice %13 {offsets = [0, 2, 0], sizes = [2, 8, 16], strides = [1, 1, 1]} : vector<2x10x16xf32> to vector<2x8x16xf32>
    %48 = vector.broadcast %8 : f32 to vector<2x8x16xf32>
    %49 = arith.mulf %48, %47 : vector<2x8x16xf32>
    %50 = arith.addf %46, %49 : vector<2x8x16xf32>
    %c0_3 = arith.constant 0 : index
    %c0_4 = arith.constant 0 : index
    %c0_5 = arith.constant 0 : index
    %51 = vector.load %arg3[%c0_3, %c0_4, %c0_5] : memref<2x8x16xf32, #tpu.memory_space<vmem>>, vector<2x8x16xf32>
    tpu.vector_store %arg3[%c0_3, %c0_4, %c0_5], %50 {strides = array<i32>} : memref<2x8x16xf32, #tpu.memory_space<vmem>>, vector<2x8x16xf32>,
    return
  }
  func.func @transform_0(%arg0: i32, %arg1: memref<10xf32, #tpu.memory_space<smem>>) -> (i32, i32, i32) {
    %c0_i32 = arith.constant 0 : i32
    %c0_i32_0 = arith.constant 0 : i32
    %c0_i32_1 = arith.constant 0 : i32
    return %arg0, %c0_i32, %c0_i32_0 : i32, i32, i32
  }
  func.func @transform_1(%arg0: i32, %arg1: memref<10xf32, #tpu.memory_space<smem>>) -> (i32, i32, i32) {
    %c0_i32 = arith.constant 0 : i32
    %c0_i32_0 = arith.constant 0 : i32
    %c0_i32_1 = arith.constant 0 : i32
    return %arg0, %c0_i32, %c0_i32_0 : i32, i32, i32
  }
}

</mosaic_0001>

<bundles_post_ra>
// kernel: cnn_on_batch_forward.1
= control target key start
LH: loop header
LB: loop body
LE: loop exit
PB: predicated region body
PF: predicated region fallthrough
CT: control target
= control target key end

     0   :  { %s336_s0 = inlined_call_operand.vmem [shape: f32[10], index: 0, kind: input, shape index: {}]   ;;  %s337_s1 = inlined_call_operand.vmem [shape: f32[2,10,18], index: 1, kind: input, shape index: {}]   ;;  %s338_s2 = inlined_call_operand.vmem [shape: f32[2,8,16], index: 2, kind: output, shape index: {}]  }
   0x1   :  { %s7_s11 = sshll.u32 %s336_s0, 4  ;;  %s8_s11 = int_to_ptr.vmem [resolvable:$true] %s7_s11 }
   0x2   :  { %s212_s12 = scalar_lea.vmem %s8_s11, 16  ;;  %p217_p1 = scmp.lt.s32.totalorder %s8_s11, %s8_s11 }
   0x3   :  { %p213_p0 = scmp.ne.s32.totalorder %s8_s11, %s212_s12  ;;  %p218_p2 = scmp.lt.s32.totalorder %s212_s12, %s212_s12 }
   0x5   :  { %p219_p3 = por %p218_p2, %p217_p1 }
   0x7   :  { %p220_p4 = pnand %p219_p3, %p213_p0 }
   0x9   :  { %223 = shalt.err (!%p220_p4)  }
   0xa   :  { %s226_s13 = smov [#allocation3]  }
   0xb   :  { %10 = dma.vmem_to_smem %s8_s11, 16, %s226_s13, [#allocation2] }
   0xc   :  { %224 = dma.done.wait [#allocation2], 16 }
   0xd   :  { %225 = vsyncadd [#allocation2], 4294967280 }
   0xe   :  { %12 = sfence }
   0xf   :  { %s201_s14 = sld [smem:[#allocation3 + $0x2]]  ;;  %s200_s15 = sld [smem:[#allocation3 + $0x1]]  ;;  %v250_v0 = vld [vmem:[%s337_s1] sm:$0xff]  ;;  %v255_v1 = vld [vmem:[%s337_s1 + $0x10] sm:$0xff]  ;;  %v264_v3 = vld [vmem:[%s337_s1 + $0x18] sm:$0x3] }
  0x10   :  { %s203_s16 = sld [smem:[#allocation3 + $0x4]]  ;;  %s204_s17 = sld [smem:[#allocation3 + $0x5]]  ;;  %v269_v4 = vld [vmem:[%s337_s1 + $0x8] sm:$0x3]  ;;  %vm70_vm0 = vcmask 1046528   ;;  %vm136_vm1 = vcmask 1045504  }
  0x11   :  { %s257_s21 = sld [smem:[#allocation3 + $0x7]]  ;;  %s259_s22 = sld [smem:[#allocation3 + $0x8]]  ;;  %vm193_vm2 = vcmask 130048  }
  0x12   :  { %s227_s27 = smov 126   ;;  %s228_s1 = smov 127  }
  0x13   :  { %s202_s28 = sld [smem:[#allocation3 + $0x3]]  ;;  %s288_s29 = sld [smem:[#allocation3 + $0x6]] }
  0x14   :  { %s15_s30 = sld [smem:[#allocation3]]  ;;  %s208_s3 = sld [smem:[#allocation3 + $0x9]] }
  0x15   :  { %v48_v2 = vstv %s201_s14  ;;  %v35_v7 = vstv %s200_s15 }
  0x16   :  { %v49_v5 = vmul.f32 %v48_v2, %v250_v0  ;;  %v50_v6 = vmul.f32 %v48_v2, %v255_v1  ;;  %v36_v8 = vmul.f32 %v35_v7, %v250_v0  ;;  %v37_v9 = vmul.f32 %v35_v7, %v255_v1 }
  0x17   :  { %v81_v10 = vstv %s203_s16  ;;  %v104_v11 = vstv %s204_s17  ;;  %v147_v27 = vstv %s257_s21  ;;  %v170_v28 = vstv %s259_s22 }
  0x18   :  { %53 = vrot.lane.b32.xlu1 %v49_v5, %s227_s27  ;;  %v84_v12 = vmul.f32 %v81_v10, %v255_v1  ;;  %v85_v13 = vmul.f32 %v81_v10, %v264_v3  ;;  %v82_v14 = vmul.f32 %v81_v10, %v250_v0  ;;  %v83_v15 = vmul.f32 %v81_v10, %v269_v4 }
  0x19   :  { %40 = vrot.lane.b32.xlu0 %v36_v8, %s228_s1  ;;  %v107_v16 = vmul.f32 %v104_v11, %v255_v1  ;;  %v108_v17 = vmul.f32 %v104_v11, %v264_v3  ;;  %v105_v18 = vmul.f32 %v104_v11, %v250_v0  ;;  %v106_v19 = vmul.f32 %v104_v11, %v269_v4 }
  0x1a   :  { %v93_v20 = vrot.slane %v84_v12, 1  ;;  %v94_v21 = vrot.slane %v85_v13, 1  ;;  %v90_v22 = vrot.slane %v82_v14, 1  ;;  %v91_v23 = vrot.slane %v83_v15, 1 }
  0x1b   :  { %v116_v24 = vrot.slane %v107_v16, 1  ;;  %v117_v25 = vrot.slane %v108_v17, 1  ;;  %v113_v26 = vrot.slane %v105_v18, 1  ;;  %v114_v30 = vrot.slane %v106_v19, 1 }
  0x1c   :  { %55 = vrot.lane.b32.xlu1 %v50_v6, %s227_s27  ;;  %v95_v29 = vsel %vm70_vm0, %v93_v20, %v94_v21  ;;  %v150_v31 = vmul.f32 %v147_v27, %v255_v1  ;;  %v151_v32 = vmul.f32 %v147_v27, %v264_v3  ;;  %v92_v33 = vsel %vm70_vm0, %v90_v22, %v91_v23 }
  0x1d   :  { %42 = vrot.lane.b32.xlu0 %v37_v9, %s228_s1  ;;  %v148_v34 = vmul.f32 %v147_v27, %v250_v0  ;;  %v149_v35 = vmul.f32 %v147_v27, %v269_v4  ;;  %v173_v36 = vmul.f32 %v170_v28, %v255_v1  ;;  %v174_v39 = vmul.f32 %v170_v28, %v264_v3 }
  0x1e   :  { %v159_v37 = vrot.slane %v150_v31, 2  ;;  %v160_v38 = vrot.slane %v151_v32, 2  ;;  %v171_v40 = vmul.f32 %v170_v28, %v250_v0  ;;  %v118_v41 = vsel %vm70_vm0, %v116_v24, %v117_v25 }
  0x1f   :  { %v156_v42 = vrot.slane %v148_v34, 2  ;;  %v157_v43 = vrot.slane %v149_v35, 2  ;;  %v172_v44 = vmul.f32 %v170_v28, %v269_v4  ;;  %v115_v45 = vsel %vm70_vm0, %v113_v26, %v114_v30 }
  0x20   :  { %98 = vrot.lane.b32.xlu1 %v95_v29, %s228_s1  ;;  %v182_v46 = vrot.slane %v173_v36, 2  ;;  %v61_v47 = vstv %s202_s28  ;;  %v161_v48 = vsel %vm136_vm1, %v159_v37, %v160_v38  ;;  %v183_v49 = vrot.slane %v174_v39, 2 }
  0x21   :  { %96 = vrot.lane.b32.xlu0 %v92_v33, %s228_s1  ;;  %v179_v50 = vrot.slane %v171_v40, 2  ;;  %v64_v51 = vmul.f32 %v61_v47, %v255_v1  ;;  %v65_v52 = vmul.f32 %v61_v47, %v264_v3  ;;  %v62_v53 = vmul.f32 %v61_v47, %v250_v0 }
  0x22   :  { %v63_v54 = vmul.f32 %v61_v47, %v269_v4  ;;  %v127_v55 = vstv %s288_s29  ;;  %v158_v56 = vsel %vm136_vm1, %v156_v42, %v157_v43  ;;  %v180_v57 = vrot.slane %v172_v44, 2 }
  0x23   :  { %v74_v58 = vrot.slane %v64_v51, 1  ;;  %v130_v59 = vmul.f32 %v127_v55, %v255_v1  ;;  %v75_v60 = vrot.slane %v65_v52, 1  ;;  %v71_v61 = vrot.slane %v62_v53, 1 }
  0x24   :  { %121 = vrot.lane.b32.xlu1 %v118_v41, %s227_s27  ;;  %v72_v62 = vrot.slane %v63_v54, 1  ;;  %v131_v63 = vmul.f32 %v127_v55, %v264_v3  ;;  %v128_v5 = vmul.f32 %v127_v55, %v250_v0  ;;  %v129_v6 = vmul.f32 %v127_v55, %v269_v4 }
  0x25   :  { %119 = vrot.lane.b32.xlu0 %v115_v45, %s227_s27  ;;  %v140_v2 = vrot.slane %v130_v59, 2  ;;  %v76_v7 = vsel %vm70_vm0, %v74_v58, %v75_v60  ;;  %v184_v10 = vsel %vm136_vm1, %v182_v46, %v183_v49  ;;  %v181_v3 = vsel %vm136_vm1, %v179_v50, %v180_v57 }
  0x26   :  { %v73_v8 = vsel %vm70_vm0, %v71_v61, %v72_v62  ;;  %v141_v9 = vrot.slane %v131_v63, 2  ;;  %v137_v11 = vrot.slane %v128_v5, 2  ;;  %v138_v12 = vrot.slane %v129_v6, 2 }
  0x27   :  { %v30_v4 = vstv %s15_s30  ;;  %v29_v16 = vstv %s208_s3 }
  0x28   :  { %164 = vrot.lane.b32.xlu1 %v161_v48, %s228_s1  ;;  %v142_v13 = vsel %vm136_vm1, %v140_v2, %v141_v9  ;;  %v139_v14 = vsel %vm136_vm1, %v137_v11, %v138_v12  ;;  %v31_v15 = vmul.f32 %v30_v4, %v250_v0  ;;  %v32_v18 = vmul.f32 %v30_v4, %v255_v1 }
  0x29   :  { %162 = vrot.lane.b32.xlu0 %v158_v56, %s228_s1 }
  0x2a   :  { %v33_v17 = vadd.f32 %v31_v15, %v29_v16  ;;  %v34_v22 = vadd.f32 %v32_v18, %v29_v16 }
  0x2c   :  { %187 = vrot.lane.b32.xlu1 %v184_v10, %s227_s27 }
  0x2d   :  { %185 = vrot.lane.b32.xlu0 %v181_v3, %s227_s27 }
  0x8a   :  { %v54_v19 = vpop.permute.xlu1 %53 }
  0x8b   :  { %v41_v20 = vpop.permute.xlu0 %40 }
  0x8c   :  { %v46_v21 = vadd.f32 %v41_v20, %v33_v17 }
  0x8e   :  { %v59_v23 = vadd.f32 %v54_v19, %v46_v21  ;;  %v56_v24 = vpop.permute.xlu1 %55 }
  0x8f   :  { %v43_v25 = vpop.permute.xlu0 %42 }
  0x90   :  { %v47_v26 = vadd.f32 %v43_v25, %v34_v22  ;;  %v79_v27 = vadd.f32 %v73_v8, %v59_v23 }
  0x92   :  { %v60_v28 = vadd.f32 %v56_v24, %v47_v26  ;;  %v99_v29 = vpop.permute.xlu1 %98 }
  0x93   :  { %v97_v30 = vpop.permute.xlu0 %96 }
  0x94   :  { %v80_v31 = vadd.f32 %v76_v7, %v60_v28  ;;  %v102_v33 = vadd.f32 %v97_v30, %v79_v27 }
  0x96   :  { %v103_v32 = vadd.f32 %v99_v29, %v80_v31  ;;  %v122_v0 = vpop.permute.xlu1 %121 }
  0x97   :  { %v120_v34 = vpop.permute.xlu0 %119 }
  0x98   :  { %v126_v35 = vadd.f32 %v122_v0, %v103_v32  ;;  %v125_v36 = vadd.f32 %v120_v34, %v102_v33 }
  0x9a   :  { %v165_v1 = vpop.permute.xlu1 %164  ;;  %v146_v37 = vadd.f32 %v142_v13, %v126_v35  ;;  %v145_v38 = vadd.f32 %v139_v14, %v125_v36 }
  0x9b   :  { %v163_v39 = vpop.permute.xlu0 %162 }
  0x9c   :  { %v169_v40 = vadd.f32 %v165_v1, %v146_v37  ;;  %v168_v41 = vadd.f32 %v163_v39, %v145_v38 }
  0x9e   :  { %v188_v42 = vpop.permute.xlu1 %187 }
  0x9f   :  { %v192_v43 = vadd.f32 %v188_v42, %v169_v40  ;;  %v186_v44 = vpop.permute.xlu0 %185 }
  0xa0   :  { %v191_v45 = vadd.f32 %v186_v44, %v168_v41 }
  0xa1   :  { %195 = vst.msk [vmem:[%s338_s2 + $0x8] sm:$0xff] %vm193_vm2, %v192_v43 }
  0xa2   :  { %194 = vst.msk [vmem:[%s338_s2] sm:$0xff] %vm193_vm2, %v191_v45 }

</bundles_post_ra>
